<compile_context>
chip_gen: v7x
topology: tpu7x:2x2x1
jax: 0.10.0
libtpu: 0.0.40
codegen_flags: <defaults>
</compile_context>

<pallas_src>
import math
import jax
import jax.numpy as jnp
from jax import lax
from jax.experimental import pallas as pl
from jax.experimental.pallas import tpu as pltpu

BLOCK_SIZE = 256     # causal-mask buffer size in the PyTorch module (upper bound on T)
N_EMBED = 384        # n_embed in the PyTorch module
Q_TILE = 128         # q-row tile size inside the kernel


def _head_kernel(x_ref, wqkv_ref, o_ref):
    # x_ref: (T, C) f32 (batch squeezed); wqkv_ref: (C, 3S) bf16, slabs [Wk | Wq*scale | Wv],
    # each slab S = round_up(head_size, 128) lanes, zero padded; o_ref: (T, H).
    T, C = x_ref.shape
    H = o_ref.shape[-1]
    S = wqkv_ref.shape[-1] // 3

    x = x_ref[...].astype(jnp.bfloat16)                    # cast in VMEM, not in the wrapper
    w = wqkv_ref[...]                                      # (C, 3S) bf16

    # Single fused projection on the MXU, f32 accumulation.  Scale already folded into Wq.
    qkv = jnp.dot(x, w, preferred_element_type=jnp.float32)   # (T, 3S) f32
    # 128-lane-aligned slab slices (no sub-vreg lane shifts); padded columns are exactly zero.
    k = qkv[:, 0 * S:1 * S].astype(jnp.bfloat16)               # (T, S)
    q = qkv[:, 1 * S:2 * S].astype(jnp.bfloat16)               # (T, S)
    v = qkv[:, 2 * S:3 * S].astype(jnp.bfloat16)               # (T, S)

    tq = T if T <= Q_TILE else Q_TILE
    num_tiles = (T + tq - 1) // tq                             # static (<=2 for block_size=256)

    for ti in range(num_tiles):                                # static Python loop
        r0 = ti * tq
        rows = min(tq, T - r0)
        kv_len = r0 + rows          # causal: keys past the tile's last row are fully masked

        q_t = q[r0:r0 + rows, :]                               # (rows, S)
        k_t = k[:kv_len, :]                                    # (kv_len, S)
        v_t = v[:kv_len, :]                                    # (kv_len, S)

        # Scores: q_t @ k_t^T, contracting the padded S axis directly on the MXU
        # (transposed operand consumed by the MXU; padded zero lanes contribute nothing).
        wei = lax.dot_general(
            q_t, k_t,
            dimension_numbers=(((1,), (1,)), ((), ())),
            preferred_element_type=jnp.float32)                # (rows, kv_len) f32

        # Causal mask via broadcast compare of absolute row/col indices.
        row = lax.broadcasted_iota(jnp.int32, (rows, 1), 0) + r0
        col = lax.broadcasted_iota(jnp.int32, (1, kv_len), 1)
        wei = jnp.where(col <= row, wei, -jnp.inf)

        # Numerically stable softmax (diagonal always unmasked -> finite row max).
        wei = wei - jnp.max(wei, axis=-1, keepdims=True)
        p = jnp.exp(wei)                                       # (rows, kv_len) f32, unnormalized
        l = jnp.sum(p, axis=-1, keepdims=True)                 # (rows, 1)

        # Weighted sum of values on the MXU; normalize at the (rows, H) output,
        # softmax denominator reciprocal on the EUP.
        out = jnp.dot(p.astype(jnp.bfloat16), v_t,
                      preferred_element_type=jnp.float32)      # (rows, S); padded cols are zero
        out = out[:, :H] * pl.reciprocal(l, approx=True)       # (rows, H)

        o_ref[r0:r0 + rows, :] = out.astype(o_ref.dtype)


def prepare_head_params(w_key, w_query, w_value):
    """One-time param prep (NOT per-call): fuse + pad + bf16-cast the three projection weights.

    w_*: (C, head_size) f32 (pre-transposed nn.Linear weights).
    Returns (C, 3*S) bf16 with S = round_up(head_size, 128), slabs [Wk | Wq/sqrt(H) | Wv],
    zero padded so every slab starts at a 128-lane-aligned offset.
    """
    C, H = w_key.shape
    S = ((H + 127) // 128) * 128
    scale = 1.0 / math.sqrt(float(H))                          # matches k.size(-1) ** 0.5

    def slab(w):
        if H < S:
            w = jnp.pad(w, ((0, 0), (0, S - H)))
        return w

    w_qkv = jnp.concatenate([slab(w_key), slab(w_query * scale), slab(w_value)], axis=1)
    return w_qkv.astype(jnp.bfloat16)


def head_forward(x, w_qkv, head_size):
    """x: (B, T, C) f32.  w_qkv: fused bf16 weight from prepare_head_params()."""
    B, T, C = x.shape
    S3 = w_qkv.shape[1]
    assert T <= BLOCK_SIZE and C == w_qkv.shape[0] and S3 % (3 * 128) == 0
    assert T % 8 == 0, "pad T to a multiple of 8 for dense f32 sublane layout"

    grid_spec = pltpu.PrefetchScalarGridSpec(
        num_scalar_prefetch=0,
        grid=(B,),
        in_specs=[
            pl.BlockSpec((pl.Squeezed(), T, C), lambda b: (b, 0, 0)),  # x: one batch element (f32)
            pl.BlockSpec((C, S3), lambda b: (0, 0)),                   # fused, pre-padded W_qkv
        ],
        out_specs=pl.BlockSpec((pl.Squeezed(), T, head_size), lambda b: (b, 0, 0)),
    )
    return pl.pallas_call(
        _head_kernel,
        out_shape=jax.ShapeDtypeStruct((B, T, head_size), x.dtype),
        grid_spec=grid_spec,
        compiler_params=pltpu.CompilerParams(dimension_semantics=("parallel",)),
    )(x, w_qkv)


def head_reference(x, w_key, w_query, w_value):
    """Pure-JAX f32 reference matching the PyTorch forward exactly (eval mode)."""
    k = x @ w_key
    q = x @ w_query
    v = x @ w_value
    wei = q @ jnp.swapaxes(k, -2, -1) / math.sqrt(k.shape[-1])
    T = x.shape[1]
    tril = jnp.tril(jnp.ones((T, T), dtype=bool))
    wei = jnp.where(tril, wei, -jnp.inf)
    wei = jax.nn.softmax(wei, axis=-1)
    return wei @ v


if __name__ == "__main__":
    # Small shapes consistent with the module: B=2, T=128 (<= block_size), C=n_embed=384, head_size=64
    B, T, C, HEAD_SIZE = 2, 128, N_EMBED, 64
    DROPOUT = 0.0  # eval-mode semantics

    key = jax.random.PRNGKey(0)
    kx, kk, kq, kv = jax.random.split(key, 4)

    x = jax.random.normal(kx, (B, T, C), dtype=jnp.float32)

    # Deterministic init of the three nn.Linear(n_embed, head_size, bias=False) weights,
    # emulating PyTorch's kaiming-uniform bound 1/sqrt(fan_in); stored as (C, head_size).
    bound = 1.0 / math.sqrt(C)
    w_key = jax.random.uniform(kk, (C, HEAD_SIZE), jnp.float32, -bound, bound)
    w_query = jax.random.uniform(kq, (C, HEAD_SIZE), jnp.float32, -bound, bound)
    w_value = jax.random.uniform(kv, (C, HEAD_SIZE), jnp.float32, -bound, bound)

    # One-time param prep (done at init in a real model, not per forward call).
    w_qkv = jax.block_until_ready(prepare_head_params(w_key, w_query, w_value))

    out = head_forward(x, w_qkv, HEAD_SIZE)
    out = jax.block_until_ready(out)

    ref = head_reference(x, w_key, w_query, w_value)
    assert out.shape == (B, T, HEAD_SIZE)
    # bf16 MXU operands + approx reciprocal -> loosened tolerance vs. the f32 reference.
    err = float(jnp.max(jnp.abs(out - ref)))
    assert jnp.allclose(out, ref, atol=5e-2, rtol=5e-2), err

    print("KERNEL_OK")
</pallas_src>

<mosaic_0001>
module attributes {stable_mosaic.version = 11 : i64} {
  func.func @_head_kernel(%arg0: i32, %arg1: memref<1x128x384xf32, #tpu.memory_space<vmem>>, %arg2: memref<384x384xbf16, #tpu.memory_space<vmem>>, %arg3: memref<1x128x64xf32, #tpu.memory_space<vmem>>) attributes {dimension_semantics = [#tpu.dimension_semantics<parallel>], iteration_bounds = array<i64: 2>, scalar_prefetch = 0 : i64, scratch_operands = 0 : i64, tpu.core_type = #tpu.core_type<tc>, window_params = [{transform_indices = @transform_0, window_bounds = array<i64: 1, 128, 384>}, {pipeline_mode = #tpu.pipeline_mode<synchronous>, transform_indices = @transform_1, window_bounds = array<i64: 384, 384>}, {transform_indices = @transform_2, window_bounds = array<i64: 1, 128, 64>}]} {
    %c0 = arith.constant 0 : index
    %c0_0 = arith.constant 0 : index
    %c0_1 = arith.constant 0 : index
    %0 = vector.load %arg1[%c0, %c0_0, %c0_1] : memref<1x128x384xf32, #tpu.memory_space<vmem>>, vector<1x128x384xf32>
    %1 = vector.shape_cast %0 : vector<1x128x384xf32> to vector<128x384xf32>
    %2 = arith.truncf %1 : vector<128x384xf32> to vector<128x384xbf16>
    %c0_2 = arith.constant 0 : index
    %c0_3 = arith.constant 0 : index
    %3 = vector.load %arg2[%c0_2, %c0_3] : memref<384x384xbf16, #tpu.memory_space<vmem>>, vector<384x384xbf16>
    %cst = arith.constant dense<0.000000e+00> : vector<128x384xf32>
    %4 = tpu.matmul %2, %3, %cst {dimension_numbers = #tpu.dot_dimension_numbers<[1], [0], [0], [1], [0, 0, 1, 1], [], []>} : vector<128x384xbf16>, vector<384x384xbf16>, vector<128x384xf32> -> vector<128x384xf32>
    %5 = vector.extract_strided_slice %4 {offsets = [0, 0], sizes = [128, 128], strides = [1, 1]} : vector<128x384xf32> to vector<128x128xf32>
    %6 = arith.truncf %5 : vector<128x128xf32> to vector<128x128xbf16>
    %7 = vector.extract_strided_slice %4 {offsets = [0, 128], sizes = [128, 128], strides = [1, 1]} : vector<128x384xf32> to vector<128x128xf32>
    %8 = arith.truncf %7 : vector<128x128xf32> to vector<128x128xbf16>
    %9 = vector.extract_strided_slice %4 {offsets = [0, 256], sizes = [128, 128], strides = [1, 1]} : vector<128x384xf32> to vector<128x128xf32>
    %10 = arith.truncf %9 : vector<128x128xf32> to vector<128x128xbf16>
    %cst_4 = arith.constant dense<0.000000e+00> : vector<128x128xf32>
    %11 = tpu.matmul %8, %6, %cst_4 {dimension_numbers = #tpu.dot_dimension_numbers<[1], [1], [0], [0], [0, 0, 1, 0], [], []>} : vector<128x128xbf16>, vector<128x128xbf16>, vector<128x128xf32> -> vector<128x128xf32>
    %12 = tpu.iota {dimensions = array<i32: 0>} : vector<128x1xi32>
    %c0_i32 = arith.constant 0 : i32
    %13 = vector.broadcast %c0_i32 : i32 to vector<128x1xi32>
    %14 = arith.addi %12, %13 : vector<128x1xi32>
    %15 = tpu.iota {dimensions = array<i32: 1>} : vector<1x128xi32>
    %16 = vector.broadcast %15 : vector<1x128xi32> to vector<128x128xi32>
    %17 = vector.broadcast %14 : vector<128x1xi32> to vector<128x128xi32>
    %18 = arith.cmpi sle, %16, %17 : vector<128x128xi32>
    %cst_5 = arith.constant 0xFF800000 : f32
    %19 = vector.broadcast %cst_5 : f32 to vector<128x128xf32>
    %20 = arith.select %18, %11, %19 : vector<128x128xi1>, vector<128x128xf32>
    %cst_6 = arith.constant dense<0xFF800000> : vector<128xf32>
    %21 = vector.multi_reduction <maximumf>, %20, %cst_6 [1] : vector<128x128xf32> to vector<128xf32>
    %22 = vector.shape_cast %21 : vector<128xf32> to vector<128x1xf32>
    %23 = vector.broadcast %22 : vector<128x1xf32> to vector<128x128xf32>
    %24 = arith.subf %20, %23 : vector<128x128xf32>
    %25 = math.exp %24 : vector<128x128xf32>
    %cst_7 = arith.constant dense<0.000000e+00> : vector<128xf32>
    %26 = vector.multi_reduction <add>, %25, %cst_7 [1] : vector<128x128xf32> to vector<128xf32>
    %27 = vector.shape_cast %26 : vector<128xf32> to vector<128x1xf32>
    %28 = arith.truncf %25 : vector<128x128xf32> to vector<128x128xbf16>
    %cst_8 = arith.constant dense<0.000000e+00> : vector<128x128xf32>
    %29 = tpu.matmul %28, %10, %cst_8 {dimension_numbers = #tpu.dot_dimension_numbers<[1], [0], [0], [1], [0, 0, 1, 1], [], []>} : vector<128x128xbf16>, vector<128x128xbf16>, vector<128x128xf32> -> vector<128x128xf32>
    %30 = vector.extract_strided_slice %29 {offsets = [0, 0], sizes = [128, 64], strides = [1, 1]} : vector<128x128xf32> to vector<128x64xf32>
    %31 = tpu.reciprocal %27 {approx = true} : vector<128x1xf32> -> vector<128x1xf32>
    %32 = vector.broadcast %31 : vector<128x1xf32> to vector<128x64xf32>
    %33 = arith.mulf %30, %32 : vector<128x64xf32>
    %c0_9 = arith.constant 0 : index
    %c0_10 = arith.constant 0 : index
    %c0_11 = arith.constant 0 : index
    %34 = vector.load %arg3[%c0_9, %c0_10, %c0_11] : memref<1x128x64xf32, #tpu.memory_space<vmem>>, vector<1x128x64xf32>
    %35 = vector.shape_cast %34 : vector<1x128x64xf32> to vector<128x64xf32>
    %36 = vector.shape_cast %33 : vector<128x64xf32> to vector<1x128x64xf32>
    tpu.vector_store %arg3[%c0_9, %c0_10, %c0_11], %36 {strides = array<i32>} : memref<1x128x64xf32, #tpu.memory_space<vmem>>, vector<1x128x64xf32>,
    return
  }
  func.func @transform_0(%arg0: i32) -> (i32, i32, i32) {
    %c0_i32 = arith.constant 0 : i32
    %c0_i32_0 = arith.constant 0 : i32
    %c0_i32_1 = arith.constant 0 : i32
    return %arg0, %c0_i32, %c0_i32_0 : i32, i32, i32
  }
  func.func @transform_1(%arg0: i32) -> (i32, i32) {
    %c0_i32 = arith.constant 0 : i32
    %c0_i32_0 = arith.constant 0 : i32
    %c0_i32_1 = arith.constant 0 : i32
    return %c0_i32, %c0_i32_0 : i32, i32
  }
  func.func @transform_2(%arg0: i32) -> (i32, i32, i32) {
    %c0_i32 = arith.constant 0 : i32
    %c0_i32_0 = arith.constant 0 : i32
    %c0_i32_1 = arith.constant 0 : i32
    return %arg0, %c0_i32, %c0_i32_0 : i32, i32, i32
  }
}

</mosaic_0001>

<bundles_post_ra>
// kernel: tpu_custom_call.1
= control target key start
LH: loop header
LB: loop body
LE: loop exit
PB: predicated region body
PF: predicated region fallthrough
CT: control target
= control target key end

     0   :  { %7 = vsyncpa [#allocation3], 0  ;;  %s2806_s0 = inlined_call_operand.hbm [shape: f32[2,128,384], index: 0, kind: input, shape index: {}]   ;;  %s2807_s1 = inlined_call_operand.hbm [shape: bf16[384,384], index: 1, kind: input, shape index: {}]   ;;  %s2808_s2 = inlined_call_operand.vmem [shape: f32[2,128,64], index: 2, kind: output, shape index: {}]  }
   0x1   :  { %9 = vsyncpa [#allocation3 + $0x1], 0 }
   0x2   :  { %10 = vsyncpa [#allocation5], 0  ;;  %s2345_s9 = smov 0   ;;  %s2347_s10 = smov 0  }
   0x3   :  { %s2349_s11 = smov 0   ;;  %s2351_s12 = smov 0  }
   0x4 LB: > { %s2364_s13 = sadd.s32 4294967295, %s2321_s12   ;;  %p36_p0 = scmp.ne.s32.totalorder %s2313_s10, %s2309_s9  ;;  %s2321_s12 = sphi %s2351_s12, %s2823_s12   ;;  %s2317_s11 = sphi %s2349_s11, %s2822_s11   ;;  %s2313_s10 = sphi %s2347_s10, %s2821_s10   ;;  %s2309_s9 = sphi %s2345_s9, %s2820_s9  }
   0x5   : > { %p2809_p1 = scmp.eq.s32.totalorder %s2364_s13, 0  ;;  %p1668_p2 = scmp.ge.s32.totalorder %s2321_s12, 1 }
   0x6   : > { %p94_p3 = scmp.lt.s32.totalorder %s2321_s12, 3  ;;  %s2323_s16 = smov [#allocation4]  }
   0x7   : > { %p2372_p4 = por %p2809_p1, %p36_p0  ;;  %s106_s17 = sshll.u32 %s2323_s16, 4  ;;  %s107_s17 = int_to_ptr.vmem [resolvable:$true] %s106_s17 }
   0x8   : > { %p2376_p5 = pnand %p1668_p2, %p94_p3  ;;  %s2389_s19 = sadd.s32 1, %s2321_s12  }
   0x9   : > { %s2812_s14 = scalar_select %p2372_p4, 1, 0 }
   0xa   : > { %s2813_s15 = scalar_select %p2376_p5, 1, 0 }
   0xb   : > { %p2016_p6 = pneg %p2376_p5  ;;  %s23_s20 = sadd.s32 1, %s2317_s11 }
   0xc   : > { %s20_s21 = ssub.s32 %s2321_s12, %s2389_s19  ;;  %s2225_s24 = scalar_lea.hbm %s2807_s1, 9216 }
   0xd   : > { %p2384_p7 = pnand %p2016_p6, %p2809_p1  ;;  %p2226_p8 = scmp.ne.s32.totalorder %s2807_s1, %s2225_s24 }
   0xe   : > { %p2232_p12 = scmp.lt.u32.totalorder %s2225_s24, %s2807_s1 }
   0xf   : > { %p2227_p9 = pneg %p2384_p7 }
  0x11   : > { %p2228_p10 = pnand %p2227_p9, %p2226_p8 }
  0x13   : > { %p2229_p11 = pneg %p2228_p10 }
  0x15   : > { %p2234_p13 = pnand %p2232_p12, %p2229_p11 }
  0x17   : > { %2237 = shalt.err (!%p2234_p13)
}
  0x18   : > { %s2238_s29 = scalar_lea.vmem %s107_s17, 9216  ;;  %p2246_p6 = scmp.lt.s32.totalorder %s107_s17, %s107_s17 }
  0x19   : > { %p2239_p0 = scmp.ne.s32.totalorder %s107_s17, %s2238_s29  ;;  %p2247_p1 = scmp.lt.s32.totalorder %s2238_s29, %s2238_s29 }
  0x1b   : > { %p2241_p2 = pnand %p2239_p0, %p2227_p9  ;;  %p2248_p4 = por %p2247_p1, %p2246_p6 }
  0x1d   : > { %p2242_p3 = pneg %p2241_p2 }
  0x1f   : > { %p2249_p5 = pnand %p2248_p4, %p2242_p3 }
  0x21   : > { %2252 = shalt.err (!%p2249_p5)
}
  0x22   : > { %s2324_s30 = smov 192   ;;  %s2325_s3 = smov 12  }
  0x23   : > { %2019 = dma.hbm_to_vmem [thread:$0]  (!%p2384_p7), %s2807_s1, 9216, %s107_s17, [#allocation5], %s2324_s30, %s2324_s30, %s2325_s3  }
  0x24   : > { %p21_p8 = scmp.eq.s32.totalorder %s20_s21, 0  ;;  %p30_p9 = scmp.ne.s32.totalorder %s2317_s11, %s2313_s10 }
  0x25   : > { %p31_p1 = scmp.eq.s32.totalorder %s2321_s12, 0  ;;  %p2025_p4 = scmp.lt.s32.totalorder %s2321_s12, 2 }
  0x26   : > { %s2415_s6 = scalar_select %p21_p8, %s2317_s11, %s23_s20  }
  0x27   : > { %p32_p5 = por %p31_p1, %p30_p9  ;;  %s120_s7 = sand.u32 1, %s2317_s11  }
  0x28   : > { %s2007_s8 = smul.u32 384, %s120_s7  ;;  %s2258_s26 = scalar_lea.hbm %s2806_s0, 12288 }
  0x29   : > { %s2008_s9 = smul.u32 6144, %s2321_s12  ;;  %p2419_p10 = pnand %p2025_p4, %p32_p5 }
  0x2a   : > { %s124_s20 = scalar_lea.vmem [#allocation2], %s2007_s8  ;;  %s2430_s12 = scalar_lea.sflag [#allocation3], %s120_s7 }
  0x2b   : > { %s2426_s17 = scalar_lea.hbm %s2806_s0, %s2008_s9  ;;  %s131_s21 = sshll.u32 %s124_s20, 4  ;;  %s2428_s21 = int_to_ptr.vmem [resolvable:$true] %s131_s21 }
  0x2c   : > { %s2253_s23 = scalar_lea.hbm %s2426_s17, 6144  ;;  %p2255_p11 = pneg %p2419_p10 }
  0x2d   : > { %p2254_p7 = scmp.ne.s32.totalorder %s2426_s17, %s2253_s23  ;;  %p2259_p0 = scmp.lt.u32.totalorder %s2426_s17, %s2806_s0 }
  0x2e   : > { %p2260_p2 = scmp.lt.u32.totalorder %s2258_s26, %s2253_s23  ;;  %p2262_p6 = scmp.lt.u32.totalorder %s2253_s23, %s2426_s17 }
  0x2f   : > { %p2256_p12 = pnand %p2255_p11, %p2254_p7 }
  0x30   : > { %p2261_p3 = por %p2260_p2, %p2259_p0 }
  0x31   : > { %p2257_p13 = pneg %p2256_p12 }
  0x32   : > { %p2263_p8 = por %p2262_p6, %p2261_p3 }
  0x34   : > { %p2264_p9 = pnand %p2263_p8, %p2257_p13 }
  0x36   : > { %2267 = shalt.err (!%p2264_p9)
}
  0x37   : > { %s2268_s29 = scalar_lea.vmem %s2428_s21, 6144  ;;  %s2326_s30 = smov [#allocation2]  }
  0x38   : > { %p2269_p1 = scmp.ne.s32.totalorder %s2428_s21, %s2268_s29  ;;  %s2273_s3 = sshll.u32 %s2326_s30, 4  ;;  %s2274_s3 = int_to_ptr.vmem [resolvable:$false] %s2273_s3 }
  0x39   : > { %s2275_s4 = scalar_lea.vmem %s2274_s3, 12288  ;;  %p2276_p7 = scmp.lt.s32.totalorder %s2428_s21, %s2274_s3 }
  0x3a   : > { %p2271_p4 = pnand %p2269_p1, %p2255_p11  ;;  %p2277_p12 = scmp.lt.s32.totalorder %s2275_s4, %s2268_s29 }
  0x3c   : > { %p2272_p5 = pneg %p2271_p4  ;;  %p2278_p0 = por %p2277_p12, %p2276_p7 }
  0x3e   : > { %p2279_p2 = pnand %p2278_p0, %p2272_p5 }
  0x40   : > { %2282 = shalt.err (!%p2279_p2)
}
  0x41   : > { %s2327_s5 = smov 384   ;;  %s2328_s7 = smov 24  }
  0x42   : > { %2023 = dma.hbm_to_vmem [thread:$0]  (!%p2419_p10), %s2426_s17, 6144, %s2428_s21, %s2430_s12, %s2327_s5, %s2327_s5, %s2328_s7  }
  0x43   : > { %p2816_p11 = scmp.ne.s32.totalorder %s2813_s15, 0 }
  0x44   : > { %s145_s8 = sand.u32 (!%p2816_p11), 1, %s2313_s10   ;;  %p2817_p13 = scmp.ne.s32.totalorder (!%p2816_p11), %s2812_s14, 0 }
  0x45   : > { %143 = sbr.rel (%p2816_p11) target bundleno = 1116 (0x45c), region = 28  ;;  %s146_s22 = scalar_lea.sflag (!%p2816_p11), [#allocation3], %s145_s8 }
  0x46   : > { %s2009_s9 = smul.u32 (!%p2816_p11), 384, %s145_s8 }
  0x48   : > { %s2461_s18 = scalar_lea.vmem (!%p2816_p11), [#allocation2], %s2009_s9 }
  0x4c   : > { %2300 = dma.done.wait (%p2817_p13), %s146_s22, 6144  }
  0x4d   : > { %2302 = vsyncadd (%p2817_p13), %s146_s22, 4294961152  ;;  %p2818_p3 = scmp.eq.s32.totalorder %s2364_s13, 0 }
  0x4f   : > { %2304 = dma.done.wait (%p2818_p3), [#allocation5], 9216   ;;  %p2819_p10 = pmov %p2818_p3 }
  0x50   : > { %v2065_v0 = vld [vmem:[#allocation4 + $0x4] ss:$12 sps:$4 sm:$0xff]   ;;  %v2067_v1 = vld [vmem:[#allocation4] ss:$12 sps:$4 sm:$0xff]   ;;  %v2068_v2 = vld [vmem:[#allocation4 + $0x1c] ss:$12 sps:$4 sm:$0xff]  }
  0x51   : > { %2306 = vsyncadd (%p2819_p10), [#allocation5], 4294958080  ;;  %732 = vmatprep.subr.bf16.mxu0 %v2065_v0  ;;  %v2070_v3 = vld [vmem:[#allocation4 + $0x18] ss:$12 sps:$4 sm:$0xff]   ;;  %v2071_v4 = vld [vmem:[#allocation4 + $0x34] ss:$12 sps:$4 sm:$0xff]  }
  0x52   : > { %733 = vmatpush1.bf16.msra.mxu0 %v2067_v1  ;;  %v2073_v5 = vld [vmem:[#allocation4 + $0x30] ss:$12 sps:$4 sm:$0xff]   ;;  %v2074_v6 = vld [vmem:[#allocation4 + $0x4c] ss:$12 sps:$4 sm:$0xff]   ;;  %v2076_v7 = vld [vmem:[#allocation4 + $0x48] ss:$12 sps:$4 sm:$0xff]  }
  0x53   : > { %734 = vmatprep.subr.bf16.mxu0 %v2068_v2  ;;  %v2077_v8 = vld [vmem:[#allocation4 + $0x64] ss:$12 sps:$4 sm:$0xff]   ;;  %v2079_v9 = vld [vmem:[#allocation4 + $0x60] ss:$12 sps:$4 sm:$0xff]   ;;  %v2080_v10 = vld [vmem:[#allocation4 + $0x7c] ss:$12 sps:$4 sm:$0xff]  }
  0x54   : > { %v2082_v11 = vld [vmem:[#allocation4 + $0x78] ss:$12 sps:$4 sm:$0xff]   ;;  %v2083_v12 = vld [vmem:[#allocation4 + $0x94] ss:$12 sps:$4 sm:$0xff]   ;;  %v181_v13 = vld [vmem:[%s2461_s18 + $0x8] sm:$0xff]  ;;  %p174_p6 = scmp.lt.s32.totalorder %s2364_s13, 1 }
  0x55   : > { %v184_v14 = vld [vmem:[%s2461_s18 + $0x20] sm:$0xff]  ;;  %v2085_v16 = vld [vmem:[#allocation4 + $0x90] ss:$12 sps:$4 sm:$0xff]   ;;  %v2086_v17 = vld [vmem:[#allocation4 + $0xac] ss:$12 sps:$4 sm:$0xff]  }
  0x56   : > { %735 = vmatpush1.bf16.msra.mxu0 %v2070_v3  ;;  %v229_v15 = vpack.c.bf16 %v184_v14, %v181_v13  ;;  %v2088_v18 = vld [vmem:[#allocation4 + $0xa8] ss:$12 sps:$4 sm:$0xff]   ;;  %v2089_v19 = vld [vmem:[#allocation4 + $0xc4] ss:$12 sps:$4 sm:$0xff]   ;;  %v2091_v20 = vld [vmem:[#allocation4 + $0xc0] ss:$12 sps:$4 sm:$0xff]  }
  0x57   : > { %736 = vmatprep.subr.bf16.mxu0 %v2071_v4  ;;  %v2092_v21 = vld [vmem:[#allocation4 + $0xdc] ss:$12 sps:$4 sm:$0xff]   ;;  %v2094_v22 = vld [vmem:[#allocation4 + $0xd8] ss:$12 sps:$4 sm:$0xff]   ;;  %v2095_v23 = vld [vmem:[#allocation4 + $0xf4] ss:$12 sps:$4 sm:$0xff]  }
  0x58   : > { %764 = vmatprep.mubr.bf16.mxu0 %v229_v15  ;;  %990 = vmatprep.mubr.bf16.mxu1 %v229_v15  ;;  %v2097_v24 = vld [vmem:[#allocation4 + $0xf0] ss:$12 sps:$4 sm:$0xff]   ;;  %v2098_v25 = vld [vmem:[#allocation4 + $0x10c] ss:$12 sps:$4 sm:$0xff]   ;;  %v2100_v26 = vld [vmem:[#allocation4 + $0x108] ss:$12 sps:$4 sm:$0xff]  }
  0x59   : > { %v2101_v27 = vld [vmem:[#allocation4 + $0x124] ss:$12 sps:$4 sm:$0xff]   ;;  %v2103_v28 = vld [vmem:[#allocation4 + $0x120] ss:$12 sps:$4 sm:$0xff]   ;;  %v2104_v29 = vld [vmem:[#allocation4 + $0x13c] ss:$12 sps:$4 sm:$0xff]  }
  0x5a   : > { %737 = vmatpush1.bf16.msra.mxu0 %v2073_v5  ;;  %v2106_v30 = vld [vmem:[#allocation4 + $0x138] ss:$12 sps:$4 sm:$0xff]   ;;  %v2107_v31 = vld [vmem:[#allocation4 + $0x154] ss:$12 sps:$4 sm:$0xff]   ;;  %v2109_v32 = vld [vmem:[#allocation4 + $0x150] ss:$12 sps:$4 sm:$0xff]  }
  0x5b   : > { %738 = vmatprep.subr.bf16.mxu0 %v2074_v6  ;;  %v2110_v33 = vld [vmem:[#allocation4 + $0x16c] ss:$12 sps:$4 sm:$0xff]   ;;  %v2137_v34 = vld [vmem:[#allocation4 + $0xc8] ss:$12 sps:$4 sm:$0xff]   ;;  %v180_v39 = vld [vmem:[%s2461_s18] sm:$0xff]  ;;  %s2825_s13 = smov (!%p174_p6, %s2364_s13), 1 }
  0x5c   : > { %v2138_v35 = vld [vmem:[#allocation4 + $0x8] ss:$12 sps:$4 sm:$0xff]   ;;  %1751 = vmatprep.subr.bf16.mxu1 %v2137_v34  ;;  %v2139_v37 = vld [vmem:[#allocation4 + $0xe0] ss:$12 sps:$4 sm:$0xff]   ;;  %v183_v40 = vld [vmem:[%s2461_s18 + $0x18] sm:$0xff]  ;;  %s1750_s14 = sshll.u32 %s2825_s13, 7 }
  0x5d   : > { %v2112_v36 = vld [vmem:[#allocation4 + $0x168] ss:$12 sps:$4 sm:$0xff]   ;;  %1752 = vmatpush3.bf16.msra.mxu1 %v2138_v35  ;;  %v2140_v38 = vld [vmem:[#allocation4 + $0x20] ss:$12 sps:$4 sm:$0xff]   ;;  %v2141_v41 = vld [vmem:[#allocation4 + $0xf8] ss:$12 sps:$4 sm:$0xff]   ;;  %v2477_v46 = vpack.c.bf16 %v183_v40, %v180_v39  ;;  %s2759_s17 = scalar_lea.vmem %s2808_s2, %s1750_s14 }
  0x5e   : > { %739 = vmatpush1.bf16.msra.mxu0 %v2076_v7  ;;  %v2115_v42 = vld [vmem:[#allocation4 + $0x184] ss:$12 sps:$4 sm:$0xff]   ;;  %v187_v43 = vld [vmem:[%s2461_s18 + $0x38] sm:$0xff]  ;;  %1753 = vmatprep.subr.bf16.mxu1 %v2139_v37  ;;  %v2113_v45 = vld [vmem:[#allocation4 + $0x180] ss:$12 sps:$4 sm:$0xff]  }
  0x5f   : > { %740 = vmatprep.subr.bf16.mxu0 %v2077_v8  ;;  %v190_v44 = vld [vmem:[%s2461_s18 + $0x50] sm:$0xff]  ;;  %v2142_v47 = vld [vmem:[#allocation4 + $0x38] ss:$12 sps:$4 sm:$0xff]   ;;  %v2118_v49 = vld [vmem:[#allocation4 + $0x19c] ss:$12 sps:$4 sm:$0xff]  }
  0x60   : > { %v2479_v48 = vpack.c.bf16 %v190_v44, %v187_v43  ;;  %v2143_v50 = vld [vmem:[#allocation4 + $0x110] ss:$12 sps:$4 sm:$0xff]   ;;  %v189_v52 = vld [vmem:[%s2461_s18 + $0x48] sm:$0xff]  ;;  %v2116_v53 = vld [vmem:[#allocation4 + $0x198] ss:$12 sps:$4 sm:$0xff]  }
  0x61   : > { %1754 = vmatpush3.bf16.msra.mxu1 %v2140_v38  ;;  %v186_v51 = vld [vmem:[%s2461_s18 + $0x30] sm:$0xff]  ;;  %v193_v54 = vld [vmem:[%s2461_s18 + $0x68] sm:$0xff]  ;;  %v196_v55 = vld [vmem:[%s2461_s18 + $0x80] sm:$0xff] }
  0x62   : > { %741 = vmatpush1.bf16.msra.mxu0 %v2079_v9  ;;  %1755 = vmatprep.subr.bf16.mxu1 %v2141_v41  ;;  %v2144_v56 = vld [vmem:[#allocation4 + $0x50] ss:$12 sps:$4 sm:$0xff]   ;;  %v2145_v57 = vld [vmem:[#allocation4 + $0x128] ss:$12 sps:$4 sm:$0xff]   ;;  %v2487_v59 = vpack.c.bf16 %v189_v52, %v186_v51  ;;  %v2489_v61 = vpack.c.bf16 %v196_v55, %v193_v54  ;;  %v2124_v63 = vld [vmem:[#allocation4 + $0x1cc] ss:$12 sps:$4 sm:$0xff]  }
  0x63   : > { %742 = vmatprep.subr.bf16.mxu0 %v2080_v10  ;;  %v2121_v58 = vld [vmem:[#allocation4 + $0x1b4] ss:$12 sps:$4 sm:$0xff]   ;;  %v2119_v62 = vld [vmem:[#allocation4 + $0x1b0] ss:$12 sps:$4 sm:$0xff]   ;;  %v2149_v5 = vld [vmem:[#allocation4 + $0x158] ss:$12 sps:$4 sm:$0xff]  }
  0x64   : > { %v2146_v60 = vld [vmem:[#allocation4 + $0x68] ss:$12 sps:$4 sm:$0xff]   ;;  %v2147_v0 = vld [vmem:[#allocation4 + $0x140] ss:$12 sps:$4 sm:$0xff]   ;;  %v195_v3 = vld [vmem:[%s2461_s18 + $0x78] sm:$0xff] }
  0x65   : > { %1756 = vmatpush3.bf16.msra.mxu1 %v2142_v47  ;;  %v192_v1 = vld [vmem:[%s2461_s18 + $0x60] sm:$0xff]  ;;  %v2122_v4 = vld [vmem:[#allocation4 + $0x1c8] ss:$12 sps:$4 sm:$0xff]   ;;  %v199_v6 = vld [vmem:[%s2461_s18 + $0x98] sm:$0xff] }
  0x66   : > { %743 = vmatpush1.bf16.msra.mxu0 %v2082_v11  ;;  %1757 = vmatprep.subr.bf16.mxu1 %v2143_v50  ;;  %v2148_v2 = vld [vmem:[#allocation4 + $0x80] ss:$12 sps:$4 sm:$0xff]   ;;  %v202_v7 = vld [vmem:[%s2461_s18 + $0xb0] sm:$0xff]  ;;  %v2497_v9 = vpack.c.bf16 %v195_v3, %v192_v1  ;;  %v2150_v10 = vld [vmem:[#allocation4 + $0x98] ss:$12 sps:$4 sm:$0xff]  }
  0x67   : > { %744 = vmatprep.subr.bf16.mxu0 %v2083_v12  ;;  %v2127_v8 = vld [vmem:[#allocation4 + $0x1e4] ss:$12 sps:$4 sm:$0xff]   ;;  %v2499_v11 = vpack.c.bf16 %v202_v7, %v199_v6  ;;  %v2125_v12 = vld [vmem:[#allocation4 + $0x1e0] ss:$12 sps:$4 sm:$0xff]   ;;  %v2130_v13 = vld [vmem:[#allocation4 + $0x1fc] ss:$12 sps:$4 sm:$0xff]  }
  0x68   : > { %v2151_v14 = vld [vmem:[#allocation4 + $0x170] ss:$12 sps:$4 sm:$0xff]   ;;  %v213_v38 = vld [vmem:[%s2461_s18 + $0x108] sm:$0xff]  ;;  %v220_v40 = vld [vmem:[%s2461_s18 + $0x140] sm:$0xff] }
  0x69   : > { %1758 = vmatpush3.bf16.msra.mxu1 %v2144_v56  ;;  %v198_v15 = vld [vmem:[%s2461_s18 + $0x90] sm:$0xff]  ;;  %v217_v39 = vld [vmem:[%s2461_s18 + $0x128] sm:$0xff]  ;;  %v223_v47 = vld [vmem:[%s2461_s18 + $0x158] sm:$0xff]  ;;  %v2329_v56 = vmov 0  }
  0x6a   : > { %745 = vmatpush1.bf16.msra.mxu0 %v2085_v16  ;;  %1759 = vmatprep.subr.bf16.mxu1 %v2145_v57  ;;  %v2152_v16 = vld [vmem:[#allocation4 + $0xb0] ss:$12 sps:$4 sm:$0xff]   ;;  %v2157_v41 = vld [vmem:[#allocation4 + $0x1e8] ss:$12 sps:$4 sm:$0xff]   ;;  %v247_v43 = vpack.c.bf16 %v220_v40, %v217_v39  ;;  %v2158_v44 = vld [vmem:[#allocation4 + $0x200] ss:$12 sps:$4 sm:$0xff]  }
  0x6b   : > { %746 = vmatprep.subr.bf16.mxu0 %v2086_v17  ;;  %v201_v17 = vld [vmem:[%s2461_s18 + $0xa8] sm:$0xff]  ;;  %v210_v37 = vld [vmem:[%s2461_s18 + $0xf0] sm:$0xff]  ;;  %v203_v3 = vld [vmem:[%s2461_s18 + $0xb8] sm:$0xff] }
  0x6c   : > { %v2160_v52 = vld [vmem:[#allocation4 + $0x230] ss:$12 sps:$4 sm:$0xff]   ;;  %v225_v54 = vld [vmem:[%s2461_s18 + $0x168] sm:$0xff] }
  0x6d   : > { %1760 = vmatpush3.bf16.msra.mxu1 %v2146_v60  ;;  %v182_v57 = vld [vmem:[%s2461_s18 + $0x10] sm:$0xff]  ;;  %v188_v60 = vld [vmem:[%s2461_s18 + $0x40] sm:$0xff]  ;;  %v209_v6 = vld [vmem:[%s2461_s18 + $0xe8] sm:$0xff] }
  0x6e   : > { %747 = vmatpush1.bf16.msra.mxu0 %v2088_v18  ;;  %1761 = vmatprep.subr.bf16.mxu1 %v2147_v0  ;;  %v2128_v18 = vld [vmem:[#allocation4 + $0x1f8] ss:$12 sps:$4 sm:$0xff]   ;;  %v197_v0 = vld [vmem:[%s2461_s18 + $0x88] sm:$0xff] }
  0x6f   : > { %748 = vmatprep.subr.bf16.mxu0 %v2089_v19  ;;  %v2153_v19 = vld [vmem:[#allocation4 + $0x188] ss:$12 sps:$4 sm:$0xff]  }
  0x71   : > { %1762 = vmatpush3.bf16.msra.mxu1 %v2148_v2  ;;  %v200_v2 = vld [vmem:[%s2461_s18 + $0xa0] sm:$0xff] }
  0x72   : > { %749 = vmatpush1.bf16.msra.mxu0 %v2091_v20  ;;  %1763 = vmatprep.subr.bf16.mxu1 %v2149_v5  ;;  %v205_v20 = vld [vmem:[%s2461_s18 + $0xc8] sm:$0xff]  ;;  %v206_v5 = vld [vmem:[%s2461_s18 + $0xd0] sm:$0xff] }
  0x73   : > { %750 = vmatprep.subr.bf16.mxu0 %v2092_v21  ;;  %v208_v21 = vld [vmem:[%s2461_s18 + $0xe0] sm:$0xff]  ;;  %v242_v7 = vpack.c.bf16 %v209_v6, %v206_v5 }
  0x75   : > { %1764 = vmatpush3.bf16.msra.mxu1 %v2150_v10  ;;  %v218_v10 = vld [vmem:[%s2461_s18 + $0x130] sm:$0xff] }
  0x76   : > { %751 = vmatpush1.bf16.msra.mxu0 %v2094_v22  ;;  %v2133_v22 = vld [vmem:[#allocation4 + $0x214] ss:$12 sps:$4 sm:$0xff]   ;;  %1765 = vmatprep.subr.bf16.mxu1 %v2151_v14 }
  0x77   : > { %752 = vmatprep.subr.bf16.mxu0 %v2095_v23  ;;  %v237_v23 = vpack.c.bf16 %v201_v17, %v198_v15  ;;  %v224_v14 = vld [vmem:[%s2461_s18 + $0x160] sm:$0xff]  ;;  %v227_v15 = vld [vmem:[%s2461_s18 + $0x178] sm:$0xff] }
  0x79   : > { %1766 = vmatpush3.bf16.msra.mxu1 %v2152_v16  ;;  %v251_v16 = vpack.c.bf16 %v227_v15, %v224_v14 }
  0x7a   : > { %753 = vmatpush1.bf16.msra.mxu0 %v2097_v24  ;;  %v241_v24 = vpack.c.bf16 %v208_v21, %v205_v20  ;;  %1863 = vmatprep.subr.bf16.mxu1 %v2153_v19 }
  0x7b   : > { %754 = vmatprep.subr.bf16.mxu0 %v2098_v25  ;;  %v2131_v25 = vld [vmem:[#allocation4 + $0x210] ss:$12 sps:$4 sm:$0xff]  }
  0x7c   : > { %991 = vmatmul.mubr.bf16.vlgmr.msra.gmra.mrb[0].mxu1 %v2477_v46 }
  0x7d   : > { %998 = vmatprep.mubr.bf16.mxu1 %v2479_v48  ;;  %1864 = vmatpush3.bf16.msra.mxu1 %v2153_v19 }
  0x7e   : > { %755 = vmatpush1.bf16.msra.mxu0 %v2100_v26  ;;  %v2136_v26 = vld [vmem:[#allocation4 + $0x22c] ss:$12 sps:$4 sm:$0xff]  }
  0x7f   : > { %756 = vmatprep.subr.bf16.mxu0 %v2101_v27  ;;  %v2154_v27 = vld [vmem:[#allocation4 + $0x1a0] ss:$12 sps:$4 sm:$0xff]  }
  0x80   : > { %1865 = vmatprep.subr.bf16.mxu1 %v2154_v27 }
  0x81   : > { %1866 = vmatpush3.bf16.msra.mxu1 %v2154_v27 }
  0x82   : > { %757 = vmatpush1.bf16.msra.mxu0 %v2103_v28  ;;  %v204_v28 = vld [vmem:[%s2461_s18 + $0xc0] sm:$0xff] }
  0x83   : > { %758 = vmatprep.subr.bf16.mxu0 %v2104_v29  ;;  %v207_v29 = vld [vmem:[%s2461_s18 + $0xd8] sm:$0xff] }
  0x84   : > { %v240_v34 = vpack.c.bf16 %v207_v29, %v204_v28  ;;  %999 = vmatmul.mubr.bf16.gmra.mrb[4].mxu1 %v2487_v59 }
  0x85   : > { %1006 = vmatprep.mubr.bf16.mxu1 %v2489_v61 }
  0x86   : > { %759 = vmatpush1.bf16.msra.mxu0 %v2106_v30  ;;  %v2134_v30 = vld [vmem:[#allocation4 + $0x228] ss:$12 sps:$4 sm:$0xff]  }
  0x87   : > { %760 = vmatprep.subr.bf16.mxu0 %v2107_v31  ;;  %v211_v31 = vld [vmem:[%s2461_s18 + $0xf8] sm:$0xff] }
  0x8a   : > { %761 = vmatpush1.bf16.msra.mxu0 %v2109_v32  ;;  %v214_v32 = vld [vmem:[%s2461_s18 + $0x110] sm:$0xff] }
  0x8b   : > { %762 = vmatprep.subr.bf16.mxu0 %v2110_v33  ;;  %v2155_v33 = vld [vmem:[#allocation4 + $0x1b8] ss:$12 sps:$4 sm:$0xff]   ;;  %v244_v35 = vpack.c.bf16 %v214_v32, %v211_v31 }
  0x8c   : > { %1867 = vmatprep.subr.bf16.mxu1 %v2155_v33  ;;  %1007 = vmatmul.mubr.bf16.gmra.mrb[8].mxu1 %v2497_v9 }
  0x8d   : > { %1868 = vmatpush3.bf16.msra.mxu1 %v2155_v33  ;;  %1014 = vmatprep.mubr.bf16.mxu1 %v2499_v11 }
  0x8e   : > { %763 = vmatpush1.bf16.msra.mxu0 %v2112_v36  ;;  %v2156_v36 = vld [vmem:[#allocation4 + $0x1d0] ss:$12 sps:$4 sm:$0xff]  }
  0x8f   : > { %845 = vmatprep.subr.bf16.mxu0 %v2115_v42  ;;  %1869 = vmatprep.subr.bf16.mxu1 %v2156_v36  ;;  %v243_v42 = vpack.c.bf16 %v213_v38, %v210_v37 }
  0x91   : > { %765 = vmatmul.mubr.bf16.vlgmr.msra.gmra.mrb[0].mxu0 %v2477_v46  ;;  %1870 = vmatpush3.bf16.msra.mxu1 %v2156_v36  ;;  %v219_v46 = vld [vmem:[%s2461_s18 + $0x138] sm:$0xff] }
  0x92   : > { %846 = vmatpush1.bf16.msra.mxu0 %v2113_v45  ;;  %774 = vmatprep.mubr.bf16.mxu0 %v2479_v48  ;;  %v216_v45 = vld [vmem:[%s2461_s18 + $0x120] sm:$0xff]  ;;  %v226_v48 = vld [vmem:[%s2461_s18 + $0x170] sm:$0xff] }
  0x93   : > { %847 = vmatprep.subr.bf16.mxu0 %v2118_v49  ;;  %1871 = vmatprep.subr.bf16.mxu1 %v2157_v41  ;;  %v2159_v49 = vld [vmem:[#allocation4 + $0x218] ss:$12 sps:$4 sm:$0xff]   ;;  %v246_v50 = vpack.c.bf16 %v219_v46, %v216_v45  ;;  %v250_v51 = vpack.c.bf16 %v226_v48, %v223_v47 }
  0x94   : > { %1015 = vmatmul.mubr.bf16.gmra.mrb[12].mxu1 %v237_v23 }
  0x95   : > { %1872 = vmatpush3.bf16.msra.mxu1 %v2157_v41  ;;  %1022 = vmatprep.mubr.bf16.mxu1 %v241_v24 }
  0x96   : > { %848 = vmatpush1.bf16.msra.mxu0 %v2116_v53  ;;  %1873 = vmatprep.subr.bf16.mxu1 %v2158_v44  ;;  %v222_v53 = vld [vmem:[%s2461_s18 + $0x150] sm:$0xff] }
  0x97   : > { %849 = vmatprep.subr.bf16.mxu0 %v2121_v58  ;;  %v249_v55 = vpack.c.bf16 %v225_v54, %v222_v53  ;;  %v185_v58 = vld [vmem:[%s2461_s18 + $0x28] sm:$0xff] }
  0x99   : > { %775 = vmatmul.mubr.bf16.gmra.mrb[4].mxu0 %v2487_v59  ;;  %1874 = vmatpush3.bf16.msra.mxu1 %v2158_v44  ;;  %v230_v59 = vpack.c.bf16 %v185_v58, %v182_v57 }
  0x9a   : > { %784 = vmatprep.mubr.bf16.mxu0 %v2489_v61  ;;  %850 = vmatpush1.bf16.msra.mxu0 %v2119_v62  ;;  %v191_v61 = vld [vmem:[%s2461_s18 + $0x58] sm:$0xff] }
  0x9b   : > { %851 = vmatprep.subr.bf16.mxu0 %v2124_v63  ;;  %1875 = vmatprep.subr.bf16.mxu1 %v2159_v49  ;;  %v233_v62 = vpack.c.bf16 %v191_v61, %v188_v60  ;;  %v194_v63 = vld [vmem:[%s2461_s18 + $0x70] sm:$0xff] }
  0x9c   : > { %1023 = vmatmul.mubr.bf16.gmra.mrb[16].mxu1 %v240_v34  ;;  %v236_v1 = vpack.c.bf16 %v197_v0, %v194_v63 }
  0x9d   : > { %1876 = vmatpush3.bf16.msra.mxu1 %v2159_v49  ;;  %1030 = vmatprep.mubr.bf16.mxu1 %v244_v35 }
  0x9e   : > { %852 = vmatpush1.bf16.msra.mxu0 %v2122_v4  ;;  %1877 = vmatprep.subr.bf16.mxu1 %v2160_v52  ;;  %v239_v4 = vpack.c.bf16 %v203_v3, %v200_v2 }
  0x9f   : > { %853 = vmatprep.subr.bf16.mxu0 %v2127_v8  ;;  %v212_v8 = vld [vmem:[%s2461_s18 + $0x100] sm:$0xff] }
  0xa1   : > { %785 = vmatmul.mubr.bf16.gmra.mrb[8].mxu0 %v2497_v9  ;;  %1878 = vmatpush3.bf16.msra.mxu1 %v2160_v52  ;;  %v215_v9 = vld [vmem:[%s2461_s18 + $0x118] sm:$0xff] }
  0xa2   : > { %794 = vmatprep.mubr.bf16.mxu0 %v2499_v11  ;;  %854 = vmatpush1.bf16.msra.mxu0 %v2125_v12  ;;  %v221_v11 = vld [vmem:[%s2461_s18 + $0x148] sm:$0xff]  ;;  %v245_v12 = vpack.c.bf16 %v215_v9, %v212_v8 }
  0xa3   : > { %855 = vmatprep.subr.bf16.mxu0 %v2130_v13  ;;  %v248_v13 = vpack.c.bf16 %v221_v11, %v218_v10 }
  0xa4   : > { %1031 = vmatmul.mubr.bf16.gmra.mrb[20].mxu1 %v243_v42 }
  0xa5   : > { %1038 = vmatprep.mubr.bf16.mxu1 %v247_v43 }
  0xa6   : > { %856 = vmatpush1.bf16.msra.mxu0 %v2128_v18 }
  0xa7   : > { %857 = vmatprep.subr.bf16.mxu0 %v2133_v22 }
  0xa9   : > { %795 = vmatmul.mubr.bf16.gmra.mrb[12].mxu0 %v237_v23 }
  0xaa   : > { %804 = vmatprep.mubr.bf16.mxu0 %v241_v24  ;;  %858 = vmatpush1.bf16.msra.mxu0 %v2131_v25 }
  0xab   : > { %859 = vmatprep.subr.bf16.mxu0 %v2136_v26 }
  0xac   : > { %1039 = vmatmul.mubr.bf16.gmra.mrb[24].mxu1 %v246_v50 }
  0xad   : > { %1046 = vmatprep.mubr.bf16.mxu1 %v250_v51 }
  0xae   : > { %860 = vmatpush1.bf16.msra.mxu0 %v2134_v30 }
  0xb1   : > { %805 = vmatmul.mubr.bf16.gmra.mrb[16].mxu0 %v240_v34 }
  0xb2   : > { %814 = vmatprep.mubr.bf16.mxu0 %v244_v35 }
  0xb4   : > { %1047 = vmatmul.mubr.bf16.gmra.mrb[28].mxu1 %v249_v55 }
  0xb5   : > { %1879 = vmatprep.mubr.bf16.mxu1 %v230_v59 }
  0xb9   : > { %815 = vmatmul.mubr.bf16.gmra.mrb[20].mxu0 %v243_v42 }
  0xba   : > { %824 = vmatprep.mubr.bf16.mxu0 %v247_v43 }
  0xbc   : > { %1880 = vmatmul.mubr.bf16.vlgmr.msra.gmra.mrb[32].mxu1 %v233_v62 }
  0xbd   : > { %1883 = vmatprep.mubr.bf16.mxu1 %v236_v1 }
  0xc1   : > { %825 = vmatmul.mubr.bf16.gmra.mrb[24].mxu0 %v246_v50 }
  0xc2   : > { %834 = vmatprep.mubr.bf16.mxu0 %v250_v51 }
  0xc4   : > { %1884 = vmatmul.mubr.bf16.gmra.mrb[36].mxu1 %v239_v4 }
  0xc5   : > { %1887 = vmatprep.mubr.bf16.mxu1 %v242_v7 }
  0xc9   : > { %835 = vmatmul.mubr.bf16.gmra.mrb[28].mxu0 %v249_v55 }
  0xca   : > { %877 = vmatprep.mubr.bf16.mxu0 %v2329_v56 }
  0xcc   : > { %1888 = vmatmul.mubr.bf16.gmra.mrb[40].mxu1 %v245_v12 }
  0xcd   : > { %1891 = vmatprep.mubr.bf16.mxu1 %v248_v13 }
  0xd1   : > { %878 = vmatmul.mubr.bf16.vlgmr.msra.gmra.mrb[0].mxu0 %v230_v59 }
  0xd2   : > { %887 = vmatprep.mubr.bf16.mxu0 %v2329_v56 }
  0xd4   : > { %1892 = vmatmul.mubr.bf16.gmra.mrb[44].mxu1 %v251_v16 }
  0xd9   : > { %888 = vmatmul.mubr.bf16.gmra.mrb[4].mxu0 %v233_v62 }
  0xda   : > { %897 = vmatprep.mubr.bf16.mxu0 %v2329_v56 }
  0xe1   : > { %898 = vmatmul.mubr.bf16.gmra.mrb[8].mxu0 %v236_v1 }
  0xe2   : > { %907 = vmatprep.mubr.bf16.mxu0 %v2329_v56 }
  0xe9   : > { %908 = vmatmul.mubr.bf16.gmra.mrb[12].mxu0 %v239_v4 }
  0xea   : > { %917 = vmatprep.mubr.bf16.mxu0 %v2329_v56 }
  0xf1   : > { %918 = vmatmul.mubr.bf16.gmra.mrb[16].mxu0 %v242_v7 }
  0xf2   : > { %927 = vmatprep.mubr.bf16.mxu0 %v2329_v56 }
  0xf9   : > { %928 = vmatmul.mubr.bf16.gmra.mrb[20].mxu0 %v245_v12 }
  0xfa   : > { %937 = vmatprep.mubr.bf16.mxu0 %v2329_v56 }
 0x101   : > { %938 = vmatmul.mubr.bf16.gmra.mrb[24].mxu0 %v248_v13 }
 0x102   : > { %947 = vmatprep.mubr.bf16.mxu0 %v2329_v56 }
 0x109   : > { %948 = vmatmul.mubr.bf16.gmra.mrb[28].mxu0 %v251_v16 }
 0x14f   : > { %v1767_v17 = vpop.f32.mrb[0].mxu1 }
 0x150   : > { %v1768_v18 = vpop.f32.mrb[1].mxu1 }
 0x151   : > { %v2543_v19 = vadd.f32 %v1768_v18, %v1767_v17  ;;  %v1770_v20 = vpop.f32.mrb[2].mxu1 }
 0x152   : > { %v1771_v21 = vpop.f32.mrb[3].mxu1 }
 0x153   : > { %v2545_v22 = vadd.f32 %v1771_v21, %v1770_v20 }
 0x157   : > { %v1773_v23 = vpop.f32.mrb[4].mxu1 }
 0x158   : > { %v1774_v24 = vpop.f32.mrb[5].mxu1 }
 0x159   : > { %v2547_v25 = vadd.f32 %v1774_v24, %v1773_v23  ;;  %v1776_v26 = vpop.f32.mrb[6].mxu1 }
 0x15a   : > { %v1777_v27 = vpop.f32.mrb[7].mxu1 }
 0x15b   : > { %v2549_v28 = vadd.f32 %v1777_v27, %v1776_v26 }
 0x15f   : > { %v1779_v29 = vpop.f32.mrb[8].mxu1 }
 0x160   : > { %v1780_v30 = vpop.f32.mrb[9].mxu1 }
 0x161   : > { %v2551_v31 = vadd.f32 %v1780_v30, %v1779_v29  ;;  %v1782_v32 = vpop.f32.mrb[10].mxu1 }
 0x162   : > { %v1783_v33 = vpop.f32.mrb[11].mxu1 }
 0x163   : > { %v2553_v34 = vadd.f32 %v1783_v33, %v1782_v32 }
 0x167   : > { %v1785_v35 = vpop.f32.mrb[12].mxu1 }
 0x168   : > { %v1786_v36 = vpop.f32.mrb[13].mxu1 }
 0x169   : > { %v2555_v37 = vadd.f32 %v1786_v36, %v1785_v35  ;;  %v1788_v38 = vpop.f32.mrb[14].mxu1 }
 0x16a   : > { %v1789_v39 = vpop.f32.mrb[15].mxu1 }
 0x16b   : > { %v2557_v40 = vadd.f32 %v1789_v39, %v1788_v38 }
 0x16f   : > { %v1791_v41 = vpop.f32.mrb[16].mxu1 }
 0x170   : > { %v1792_v42 = vpop.f32.mrb[17].mxu1 }
 0x171   : > { %v2559_v43 = vadd.f32 %v1792_v42, %v1791_v41  ;;  %v1794_v44 = vpop.f32.mrb[18].mxu1 }
 0x172   : > { %v1795_v45 = vpop.f32.mrb[19].mxu1 }
 0x173   : > { %v2561_v46 = vadd.f32 %v1795_v45, %v1794_v44 }
 0x177   : > { %v1797_v47 = vpop.f32.mrb[20].mxu1 }
 0x178   : > { %v1798_v49 = vpop.f32.mrb[21].mxu1 }
 0x179   : > { %v2563_v51 = vadd.f32 %v1798_v49, %v1797_v47  ;;  %v1800_v52 = vpop.f32.mrb[22].mxu1 }
 0x17a   : > { %v1801_v54 = vpop.f32.mrb[23].mxu1 }
 0x17b   : > { %v2565_v57 = vadd.f32 %v1801_v54, %v1800_v52 }
 0x17f   : > { %v1803_v59 = vpop.f32.mrb[24].mxu1 }
 0x180   : > { %v1804_v61 = vpop.f32.mrb[25].mxu1 }
 0x181   : > { %v2569_v63 = vadd.f32 %v1804_v61, %v1803_v59  ;;  %v1806_v0 = vpop.f32.mrb[26].mxu1 }
 0x182   : > { %v1807_v2 = vpop.f32.mrb[27].mxu1 }
 0x183   : > { %v2573_v5 = vadd.f32 %v1807_v2, %v1806_v0 }
 0x187   : > { %v1809_v7 = vpop.f32.mrb[28].mxu1 }
 0x188   : > { %v1810_v9 = vpop.f32.mrb[29].mxu1 }
 0x189   : > { %v2579_v11 = vadd.f32 %v1810_v9, %v1809_v7  ;;  %v1812_v12 = vpop.f32.mrb[30].mxu1 }
 0x18a   : > { %v1813_v14 = vpop.f32.mrb[31].mxu1 }
 0x18b   : > { %v2583_v17 = vadd.f32 %v1813_v14, %v1812_v12 }
 0x18f   : > { %v1881_v20 = vpop.f32.mrb[32].mxu1 }
 0x190   : > { %v1098_v23 = vadd.f32 %v1881_v20, %v2547_v25  ;;  %v1089_v24 = vpop.f32.mrb[33].mxu1 }
 0x191   : > { %v1090_v27 = vadd.f32 %v2543_v19, %v1089_v24  ;;  %v1882_v29 = vpop.f32.mrb[34].mxu1 }
 0x192   : > { %v1101_v32 = vadd.f32 %v1882_v29, %v2549_v28  ;;  %v1092_v33 = vpop.f32.mrb[35].mxu1 }
 0x193   : > { %v1093_v38 = vadd.f32 %v2545_v22, %v1092_v33 }
 0x194   : > { %v2597_v41 = vpack.c.bf16 %v1101_v32, %v1098_v23 }
 0x195   : > { %v2599_v25 = vpack.c.bf16 %v1093_v38, %v1090_v27 }
 0x197   : > { %1927 = vmatprep.subr.bf16.mxu0 %v2599_v25  ;;  %v1885_v19 = vpop.f32.mrb[36].mxu1 }
 0x198   : > { %1928 = vmatpush3.bf16.msra.mxu0 %v2599_v25  ;;  %v1114_v28 = vadd.f32 %v1885_v19, %v2555_v37  ;;  %v1105_v44 = vpop.f32.mrb[37].mxu1 }
 0x199   : > { %1929 = vmatprep.subr.bf16.mxu0 %v2597_v41  ;;  %v1106_v22 = vadd.f32 %v2551_v31, %v1105_v44  ;;  %v1886_v47 = vpop.f32.mrb[38].mxu1 }
 0x19a   : > { %v1117_v49 = vadd.f32 %v1886_v47, %v2557_v40 }
 0x19c   : > { %1930 = vmatpush3.bf16.msra.mxu0 %v2597_v41 }
 0x1a4   : > { %v879_v48 = vpop.f32.mrb[0].mxu0 }
 0x1a5   : > { %v881_v50 = vpop.f32.mrb[1].mxu0 }
 0x1a6   : > { %v883_v53 = vpop.f32.mrb[2].mxu0 }
 0x1a7   : > { %v1152_v55 = vpack.c.bf16 %v883_v53, %v879_v48  ;;  %v885_v56 = vpop.f32.mrb[3].mxu0 }
 0x1a8   : > { %v1160_v58 = vpack.c.bf16 %v885_v56, %v881_v50  ;;  %v1108_v50 = vpop.f32.mrb[39].mxu1 }
 0x1a9   : > { %1895 = vmatprep.subr.bf16.mxu1 %v1152_v55  ;;  %v1109_v54 = vadd.f32 %v2553_v34, %v1108_v50  ;;  %v1889_v31 = vpop.f32.mrb[40].mxu1 }
 0x1aa   : > { %1896 = vmatpush3.bf16.xpose.msra.mxu1 %v1152_v55  ;;  %1911 = vmatprep.mubr.bf16.mxu1 %v1160_v58  ;;  %v2615_v55 = vpack.c.bf16 %v1117_v49, %v1114_v28  ;;  %v1130_v58 = vadd.f32 %v1889_v31, %v2563_v51  ;;  %v1121_v34 = vpop.f32.mrb[41].mxu1 }
 0x1ab   : > { %v2617_v56 = vpack.c.bf16 %v1109_v54, %v1106_v22  ;;  %v1890_v61 = vpop.f32.mrb[42].mxu1 }
 0x1ac   : > { %v889_v60 = vpop.f32.mrb[4].mxu0  ;;  %v1124_v2 = vpop.f32.mrb[43].mxu1 }
 0x1ad   : > { %v2567_v62 = vpop.f32.mrb[5].mxu0  ;;  %1931 = vmatprep.subr.bf16.mxu0 %v2617_v56 }
 0x1ae   : > { %v893_v1 = vpop.f32.mrb[6].mxu0  ;;  %1932 = vmatpush3.bf16.msra.mxu0 %v2617_v56 }
 0x1af   : > { %v1153_v3 = vpack.c.bf16 %v893_v1, %v889_v60  ;;  %v2571_v4 = vpop.f32.mrb[7].mxu0  ;;  %1933 = vmatprep.subr.bf16.mxu0 %v2615_v55  ;;  %v1122_v60 = vadd.f32 %v2559_v43, %v1121_v34  ;;  %v1133_v1 = vadd.f32 %v1890_v61, %v2565_v57 }
 0x1b0   : > { %v1161_v6 = vpack.c.bf16 %v2571_v4, %v2567_v62  ;;  %v1273_v62 = vlaneseq }
 0x1b1   : > { %1897 = vmatprep.subr.bf16.mxu1 %v1153_v3  ;;  %v1173_v51 = vpack.c.bf16 %v1133_v1, %v1130_v58 }
 0x1b2   : > { %1898 = vmatpush3.bf16.xpose.msra.mxu1 %v1153_v3  ;;  %1934 = vmatpush3.bf16.msra.mxu0 %v2615_v55  ;;  %v2654_v4 = vshrl.u32 %v1273_v62, 7 }
 0x1b4   : > { %v899_v8 = vpop.f32.mrb[8].mxu0  ;;  %v1279_v44 = vadd.s32 40, %v2654_v4  ;;  %v1278_v50 = vadd.s32 32, %v2654_v4  ;;  %v1283_v61 = vadd.s32 72, %v2654_v4 }
 0x1b5   : > { %v2577_v10 = vpop.f32.mrb[9].mxu0 }
 0x1b6   : > { %v903_v13 = vpop.f32.mrb[10].mxu0 }
 0x1b7   : > { %v1154_v15 = vpack.c.bf16 %v903_v13, %v899_v8  ;;  %v2581_v16 = vpop.f32.mrb[11].mxu0  ;;  %v1125_v8 = vadd.f32 %v2561_v46, %v1124_v2  ;;  %v1893_v13 = vpop.f32.mrb[44].mxu1 }
 0x1b8   : > { %v1162_v18 = vpack.c.bf16 %v2581_v16, %v2577_v10  ;;  %v1146_v14 = vadd.f32 %v1893_v13, %v2579_v11  ;;  %v1137_v57 = vpop.f32.mrb[45].mxu1  ;;  %v1277_v10 = vadd.s32 24, %v2654_v4 }
 0x1b9   : > { %1899 = vmatprep.subr.bf16.mxu1 %v1154_v15  ;;  %v1172_v12 = vpack.c.bf16 %v1125_v8, %v1122_v60  ;;  %v1138_v20 = vadd.f32 %v2569_v63, %v1137_v57  ;;  %v1894_v46 = vpop.f32.mrb[46].mxu1 }
 0x1ba   : > { %1900 = vmatpush3.bf16.xpose.msra.mxu1 %v1154_v15  ;;  %v1149_v23 = vadd.f32 %v1894_v46, %v2583_v17  ;;  %v1140_v24 = vpop.f32.mrb[47].mxu1 }
 0x1bb   : > { %1935 = vmatprep.subr.bf16.mxu0 %v1172_v12 }
 0x1bc   : > { %v909_v21 = vpop.f32.mrb[12].mxu0  ;;  %1936 = vmatpush3.bf16.msra.mxu0 %v1172_v12  ;;  %v1175_v33 = vpack.c.bf16 %v1149_v23, %v1146_v14  ;;  %v1287_v14 = vadd.s32 104, %v2654_v4 }
 0x1bd   : > { %v2588_v26 = vpop.f32.mrb[13].mxu0  ;;  %1937 = vmatprep.subr.bf16.mxu0 %v1173_v51 }
 0x1be   : > { %v913_v30 = vpop.f32.mrb[14].mxu0 }
 0x1bf   : > { %v1155_v35 = vpack.c.bf16 %v913_v30, %v909_v21  ;;  %v2592_v36 = vpop.f32.mrb[15].mxu0  ;;  %v1141_v30 = vadd.f32 %v2573_v5, %v1140_v24  ;;  %v1276_v5 = vadd.s32 16, %v2654_v4 }
 0x1c0   : > { %v1163_v39 = vpack.c.bf16 %v2592_v36, %v2588_v26  ;;  %1938 = vmatpush3.bf16.msra.mxu0 %v1173_v51 }
 0x1c1   : > { %1901 = vmatprep.subr.bf16.mxu1 %v1155_v35 }
 0x1c2   : > { %1902 = vmatpush3.bf16.xpose.msra.mxu1 %v1155_v35  ;;  %v1174_v35 = vpack.c.bf16 %v1141_v30, %v1138_v20  ;;  %v1289_v20 = vadd.s32 120, %v2654_v4 }
 0x1c4   : > { %v919_v42 = vpop.f32.mrb[16].mxu0  ;;  %1939 = vmatprep.subr.bf16.mxu0 %v1174_v35 }
 0x1c5   : > { %v2604_v45 = vpop.f32.mrb[17].mxu0  ;;  %1940 = vmatpush3.bf16.msra.mxu0 %v1174_v35 }
 0x1c6   : > { %v923_v48 = vpop.f32.mrb[18].mxu0  ;;  %1941 = vmatprep.subr.bf16.mxu0 %v1175_v33 }
 0x1c7   : > { %v1156_v52 = vpack.c.bf16 %v923_v48, %v919_v42  ;;  %v2609_v53 = vpop.f32.mrb[19].mxu0 }
 0x1c8   : > { %v1164_v37 = vpack.c.bf16 %v2609_v53, %v2604_v45  ;;  %v1280_v45 = vadd.s32 48, %v2654_v4  ;;  %v1282_v53 = vadd.s32 64, %v2654_v4 }
 0x1c9   : > { %1903 = vmatprep.subr.bf16.mxu1 %v1156_v52  ;;  %1942 = vmatpush3.bf16.msra.mxu0 %v1175_v33 }
 0x1ca   : > { %1904 = vmatpush3.bf16.xpose.msra.mxu1 %v1156_v52 }
 0x1cc   : > { %v929_v40 = vpop.f32.mrb[20].mxu0 }
 0x1cd   : > { %v2622_v59 = vpop.f32.mrb[21].mxu0 }
 0x1ce   : > { %v933_v0 = vpop.f32.mrb[22].mxu0 }
 0x1cf   : > { %v1157_v3 = vpack.c.bf16 %v933_v0, %v929_v40  ;;  %v935_v7 = vpop.f32.mrb[23].mxu0  ;;  %v1286_v0 = vadd.s32 96, %v2654_v4 }
 0x1d0   : > { %v1165_v9 = vpack.c.bf16 %v935_v7, %v2622_v59  ;;  %v1288_v7 = vadd.s32 112, %v2654_v4 }
 0x1d1   : > { %1905 = vmatprep.subr.bf16.mxu1 %v1157_v3 }
 0x1d2   : > { %1906 = vmatpush3.bf16.xpose.msra.mxu1 %v1157_v3  ;;  %v1281_v3 = vadd.s32 56, %v2654_v4 }
 0x1d4   : > { %v939_v43 = vpop.f32.mrb[24].mxu0 }
 0x1d5   : > { %v941_v15 = vpop.f32.mrb[25].mxu0 }
 0x1d6   : > { %v943_v21 = vpop.f32.mrb[26].mxu0 }
 0x1d7   : > { %v1158_v27 = vpack.c.bf16 %v943_v21, %v939_v43  ;;  %v945_v29 = vpop.f32.mrb[27].mxu0 }
 0x1d8   : > { %v1166_v32 = vpack.c.bf16 %v945_v29, %v941_v15 }
 0x1d9   : > { %1907 = vmatprep.subr.bf16.mxu1 %v1158_v27 }
 0x1da   : > { %1908 = vmatpush3.bf16.xpose.msra.mxu1 %v1158_v27 }
 0x1dc   : > { %v949_v11 = vpop.f32.mrb[28].mxu0 }
 0x1dd   : > { %v951_v38 = vpop.f32.mrb[29].mxu0 }
 0x1de   : > { %v953_v63 = vpop.f32.mrb[30].mxu0 }
 0x1df   : > { %v1159_v19 = vpack.c.bf16 %v953_v63, %v949_v11  ;;  %v955_v42 = vpop.f32.mrb[31].mxu0 }
 0x1e0   : > { %v1167_v17 = vpack.c.bf16 %v955_v42, %v951_v38 }
 0x1e1   : > { %1909 = vmatprep.subr.bf16.mxu1 %v1159_v19 }
 0x1e2   : > { %1910 = vmatpush3.bf16.xpose.msra.mxu1 %v1159_v19 }
 0x1e3   : > { %1959 = vmatprep.subr.bf16.mxu1 %v2599_v25 }
 0x1e9   : > { %1912 = vmatmul.mubr.bf16.vlgmr.msra.gmra.mrb[48].mxu1 %v1161_v6  ;;  %v2657_v6 = vand.u32 127, %v1273_v62 }
 0x1ea   : > { %1915 = vmatprep.mubr.bf16.mxu1 %v1162_v18  ;;  %1967 = vmatpush3.bf16.msra.mxu1 %v2599_v25 }
 0x1eb   : > { %1960 = vmatprep.subr.bf16.mxu1 %v2597_v41  ;;  %vm1294_vm0 = vcmp.le.s32.totalorder %v2657_v6, %v1276_v5  ;;  %vm1295_vm1 = vcmp.le.s32.totalorder %v2657_v6, %v1277_v10  ;;  %vm1292_vm2 = vcmp.le.s32.totalorder %v2657_v6, %v2654_v4  ;;  %vm1297_vm4 = vcmp.le.s32.totalorder %v2657_v6, %v1279_v44 }
 0x1ec   : > { %vm1298_vm5 = vcmp.le.s32.totalorder %v2657_v6, %v1280_v45  ;;  %vm1296_vm6 = vcmp.le.s32.totalorder %v2657_v6, %v1278_v50  ;;  %vm1300_vm7 = vcmp.le.s32.totalorder %v2657_v6, %v1282_v53  ;;  %vm1301_vm10 = vcmp.le.s32.totalorder %v2657_v6, %v1283_v61 }
 0x1ed   : > { %vm1304_vm11 = vcmp.le.s32.totalorder %v2657_v6, %v1286_v0  ;;  %vm1299_vm12 = vcmp.le.s32.totalorder %v2657_v6, %v1281_v3  ;;  %vm1306_vm13 = vcmp.le.s32.totalorder %v2657_v6, %v1288_v7  ;;  %vm1305_vm14 = vcmp.le.s32.totalorder %v2657_v6, %v1287_v14 }
 0x1ee   : > { %1968 = vmatpush3.bf16.msra.mxu1 %v2597_v41  ;;  %vm1307_vm15 = vcmp.le.s32.totalorder %v2657_v6, %v1289_v20 }
 0x1ef   : > { %1961 = vmatprep.subr.bf16.mxu1 %v2617_v56 }
 0x1f1   : > { %1916 = vmatmul.mubr.bf16.gmra.mrb[52].mxu1 %v1163_v39  ;;  %v1275_v39 = vadd.s32 8, %v2654_v4 }
 0x1f2   : > { %1919 = vmatprep.mubr.bf16.mxu1 %v1164_v37  ;;  %1969 = vmatpush3.bf16.msra.mxu1 %v2617_v56  ;;  %v1285_v56 = vadd.s32 88, %v2654_v4 }
 0x1f3   : > { %1962 = vmatprep.subr.bf16.mxu1 %v2615_v55  ;;  %vm1293_vm3 = vcmp.le.s32.totalorder %v2657_v6, %v1275_v39 }
 0x1f4   : > { %vm1303_vm9 = vcmp.le.s32.totalorder %v2657_v6, %v1285_v56 }
 0x1f6   : > { %1970 = vmatpush3.bf16.msra.mxu1 %v2615_v55  ;;  %v1284_v55 = vadd.s32 80, %v2654_v4 }
 0x1f7   : > { %1963 = vmatprep.subr.bf16.mxu1 %v1172_v12 }
 0x1f8   : > { %vm1302_vm8 = vcmp.le.s32.totalorder %v2657_v6, %v1284_v55 }
 0x1f9   : > { %1920 = vmatmul.mubr.bf16.gmra.mrb[56].mxu1 %v1165_v9 }
 0x1fa   : > { %1923 = vmatprep.mubr.bf16.mxu1 %v1166_v32  ;;  %1971 = vmatpush3.bf16.msra.mxu1 %v1172_v12 }
 0x1fb   : > { %1964 = vmatprep.subr.bf16.mxu1 %v1173_v51 }
 0x1fe   : > { %1972 = vmatpush3.bf16.msra.mxu1 %v1173_v51 }
 0x1ff   : > { %1965 = vmatprep.subr.bf16.mxu1 %v1174_v35 }
 0x201   : > { %1924 = vmatmul.mubr.bf16.gmra.mrb[60].mxu1 %v1167_v17 }
 0x202   : > { %1973 = vmatpush3.bf16.msra.mxu1 %v1174_v35 }
 0x203   : > { %1966 = vmatprep.subr.bf16.mxu1 %v1175_v33 }
 0x206   : > { %1974 = vmatpush3.bf16.msra.mxu1 %v1175_v33 }
 0x2bc   : > { %v1913_v16 = vpop.f32.mrb[48].mxu1 }
 0x2bd   : > { %v1210_v18 = vpop.f32.mrb[49].mxu1  ;;  %v2662_v26 = vsel %vm1294_vm0, %v1913_v16, -inf  ;;  %vm1573_vm0 = vcmask 523264  }
 0x2be   : > { %1328 = vmax.xlane.f32.xlu0 %v2662_v26  ;;  %v1914_v36 = vpop.f32.mrb[50].mxu1  ;;  %v2671_v28 = vsel %vm1292_vm2, %v1210_v18, -inf }
 0x2bf   : > { %v1213_v41 = vpop.f32.mrb[51].mxu1  ;;  %v2668_v25 = vsel %vm1295_vm1, %v1914_v36, -inf }
 0x2c0   : > { %1330 = vmax.xlane.f32.xlu1 %v2668_v25  ;;  %v2677_v48 = vsel %vm1293_vm3, %v1213_v41, -inf }
 0x2c2   : > { %1324 = vmax.xlane.f32.xlu0 %v2671_v28 }
 0x2c4   : > { %v1917_v22 = vpop.f32.mrb[52].mxu1 }
 0x2c5   : > { %v1226_v47 = vpop.f32.mrb[53].mxu1  ;;  %v2687_v37 = vsel %vm1298_vm5, %v1917_v22, -inf }
 0x2c6   : > { %1326 = vmax.xlane.f32.xlu0 %v2677_v48  ;;  %v1918_v49 = vpop.f32.mrb[54].mxu1  ;;  %v2694_v58 = vsel %vm1296_vm6, %v1226_v47, -inf }
 0x2c7   : > { %v1229_v52 = vpop.f32.mrb[55].mxu1  ;;  %v2723_v57 = vsel %vm1299_vm12, %v1918_v49, -inf }
 0x2c8   : > { %v2684_v54 = vsel %vm1297_vm4, %v1229_v52, -inf }
 0x2c9   : > { %1334 = vmax.xlane.f32.xlu1 %v2684_v54 }
 0x2ca   : > { %1336 = vmax.xlane.f32.xlu0 %v2687_v37 }
 0x2cc   : > { %v1921_v31 = vpop.f32.mrb[56].mxu1 }
 0x2cd   : > { %v1242_v40 = vpop.f32.mrb[57].mxu1  ;;  %v2704_v1 = vsel %vm1302_vm8, %v1921_v31, -inf }
 0x2ce   : > { %1332 = vmax.xlane.f32.xlu0 %v2694_v58  ;;  %v1922_v34 = vpop.f32.mrb[58].mxu1  ;;  %v2697_v59 = vsel %vm1300_vm7, %v1242_v40, -inf }
 0x2cf   : > { %1340 = vmax.xlane.f32.xlu1 %v2697_v59  ;;  %v1245_v60 = vpop.f32.mrb[59].mxu1  ;;  %v2707_v2 = vsel %vm1303_vm9, %v1922_v34, -inf }
 0x2d0   : > { %v2714_v12 = vsel %vm1301_vm10, %v1245_v60, -inf }
 0x2d2   : > { %1344 = vmax.xlane.f32.xlu0 %v2704_v1 }
 0x2d3   : > { %1346 = vmax.xlane.f32.xlu1 %v2707_v2 }
 0x2d4   : > { %v1925_v8 = vpop.f32.mrb[60].mxu1 }
 0x2d5   : > { %v1258_v9 = vpop.f32.mrb[61].mxu1  ;;  %v2725_v15 = vsel %vm1306_vm13, %v1925_v8, -inf }
 0x2d6   : > { %v1926_v51 = vpop.f32.mrb[62].mxu1  ;;  %v2716_v13 = vsel %vm1304_vm11, %v1258_v9, -inf }
 0x2d7   : > { %1342 = vmax.xlane.f32.xlu1 %v2714_v12  ;;  %1348 = vmax.xlane.f32.xlu0 %v2716_v13  ;;  %v1261_v43 = vpop.f32.mrb[63].mxu1  ;;  %v2735_v21 = vsel %vm1307_vm15, %v1926_v51, -inf }
 0x2d8   : > { %v2731_v46 = vsel %vm1305_vm14, %v1261_v43, -inf }
 0x2db   : > { %1338 = vmax.xlane.f32.xlu1 %v2723_v57  ;;  %1352 = vmax.xlane.f32.xlu0 %v2725_v15 }
 0x2df   : > { %1350 = vmax.xlane.f32.xlu1 %v2731_v46 }
 0x2e3   : > { %1354 = vmax.xlane.f32.xlu1 %v2735_v21 }
 0x34b   : > { %v1329_v23 = vpop.xlane.xlu0 %1328 }
 0x34c   : > { %v1358_v24 = vsub.f32 %v2662_v26, %v1329_v23 }
 0x34d   : > { %v1331_v27 = vpop.xlane.xlu1 %1330 }
 0x34e   : > { %v1376_v29 = vmul.f32 1.442695, %v1358_v24  ;;  %v1359_v30 = vsub.f32 %v2668_v25, %v1331_v27 }
 0x34f   : > { %v1325_v32 = vpop.xlane.xlu0 %1324 }
 0x350   : > { %2161 = vpow2.f32 %v1376_v29  ;;  %v1378_v33 = vmul.f32 1.442695, %v1359_v30  ;;  %v1356_v35 = vsub.f32 %v2671_v28, %v1325_v32 }
 0x352   : > { %2163 = vpow2.f32 %v1378_v33  ;;  %v1372_v11 = vmul.f32 1.442695, %v1356_v35 }
 0x353   : > { %v1327_v38 = vpop.xlane.xlu0 %1326 }
 0x354   : > { %2165 = vpow2.f32 %v1372_v11  ;;  %v1357_v63 = vsub.f32 %v2677_v48, %v1327_v38 }
 0x356   : > { %v1374_v19 = vmul.f32 1.442695, %v1357_v63  ;;  %v1335_v42 = vpop.xlane.xlu1 %1334 }
 0x357   : > { %v1361_v17 = vsub.f32 %v2684_v54, %v1335_v42  ;;  %v1337_v62 = vpop.xlane.xlu0 %1336 }
 0x358   : > { %2167 = vpow2.f32 %v1374_v19  ;;  %v1362_v4 = vsub.f32 %v2687_v37, %v1337_v62 }
 0x359   : > { %v1382_v10 = vmul.f32 1.442695, %v1361_v17 }
 0x35a   : > { %v2162_v5 = vpop.eup %2161  ;;  %v1384_v6 = vmul.f32 1.442695, %v1362_v4 }
 0x35b   : > { %v1333_v16 = vpop.xlane.xlu0 %1332  ;;  %1408 = vadd.xlane.f32.xlu0 %v2162_v5 }
 0x35c   : > { %v2164_v18 = vpop.eup %2163  ;;  %2169 = vpow2.f32 %v1384_v6  ;;  %v1360_v26 = vsub.f32 %v2694_v58, %v1333_v16  ;;  %v1341_v36 = vpop.xlane.xlu1 %1340 }
 0x35d   : > { %1410 = vadd.xlane.f32.xlu1 %v2164_v18  ;;  %2171 = vpow2.f32 %v1382_v10  ;;  %v1364_v25 = vsub.f32 %v2697_v59, %v1341_v36  ;;  %v1437_v37 = vpack.c.bf16 %v2164_v18, %v2162_v5 }
 0x35e   : > { %v2166_v39 = vpop.eup %2165  ;;  %v1380_v41 = vmul.f32 1.442695, %v1360_v26 }
 0x35f   : > { %v1345_v28 = vpop.xlane.xlu0 %1344  ;;  %1404 = vadd.xlane.f32.xlu0 %v2166_v39  ;;  %v1388_v49 = vmul.f32 1.442695, %v1364_v25 }
 0x360   : > { %2173 = vpow2.f32 %v1380_v41  ;;  %v1366_v44 = vsub.f32 %v2704_v1, %v1345_v28  ;;  %v1347_v45 = vpop.xlane.xlu1 %1346 }
 0x361   : > { %v1367_v22 = vsub.f32 %v2707_v2, %v1347_v45 }
 0x362   : > { %v2168_v47 = vpop.eup %2167  ;;  %v1392_v48 = vmul.f32 1.442695, %v1366_v44 }
 0x363   : > { %1406 = vadd.xlane.f32.xlu1 %v2168_v47  ;;  %v1436_v50 = vpack.c.bf16 %v2168_v47, %v2166_v39  ;;  %v1394_v52 = vmul.f32 1.442695, %v1367_v22 }
 0x364   : > { %2175 = vpow2.f32 %v1392_v48  ;;  %v1343_v53 = vpop.xlane.xlu1 %1342  ;;  %v1349_v54 = vpop.xlane.xlu0 %1348 }
 0x365   : > { %v1365_v55 = vsub.f32 %v2714_v12, %v1343_v53  ;;  %v1368_v56 = vsub.f32 %v2716_v13, %v1349_v54  ;;  %1943 = vmatprep.mubr.bf16.mxu0 %v1436_v50  ;;  %2177 = vpow2.f32 %v1388_v49 }
 0x366   : > { %v2170_v31 = vpop.eup %2169  ;;  %1944 = vmatmul.mubr.bf16.vlgmr.msra.gmra.mrb[32].mxu0 %v1437_v37  ;;  %2179 = vpow2.f32 %v1394_v52 }
 0x367   : > { %v1390_v40 = vmul.f32 1.442695, %v1365_v55  ;;  %1416 = vadd.xlane.f32.xlu0 %v2170_v31  ;;  %v1396_v58 = vmul.f32 1.442695, %v1368_v56  ;;  %v2172_v60 = vpop.eup %2171 }
 0x368   : > { %v1339_v34 = vpop.xlane.xlu1 %1338  ;;  %v1353_v59 = vpop.xlane.xlu0 %1352 }
 0x369   : > { %2181 = vpow2.f32 %v1390_v40  ;;  %v1363_v61 = vsub.f32 %v2723_v57, %v1339_v34  ;;  %v1370_v0 = vsub.f32 %v2725_v15, %v1353_v59 }
 0x36a   : > { %v2174_v1 = vpop.eup %2173  ;;  %2183 = vpow2.f32 %v1396_v58 }
 0x36b   : > { %v1386_v2 = vmul.f32 1.442695, %v1363_v61  ;;  %1412 = vadd.xlane.f32.xlu0 %v2174_v1  ;;  %v1438_v3 = vpack.c.bf16 %v2172_v60, %v2174_v1  ;;  %v1400_v7 = vmul.f32 1.442695, %v1370_v0 }
 0x36c   : > { %v1351_v8 = vpop.xlane.xlu1 %1350 }
 0x36d   : > { %2185 = vpow2.f32 %v1386_v2  ;;  %v1369_v9 = vsub.f32 %v2731_v46, %v1351_v8  ;;  %1947 = vmatprep.mubr.bf16.mxu0 %v1438_v3 }
 0x36e   : > { %v2176_v51 = vpop.eup %2175  ;;  %2187 = vpow2.f32 %v1400_v7 }
 0x36f   : > { %v1398_v12 = vmul.f32 1.442695, %v1369_v9  ;;  %1424 = vadd.xlane.f32.xlu0 %v2176_v51  ;;  %v2178_v43 = vpop.eup %2177 }
 0x370   : > { %v1355_v13 = vpop.xlane.xlu1 %1354  ;;  %v2180_v57 = vpop.eup %2179 }
 0x371   : > { %2189 = vpow2.f32 %v1398_v12  ;;  %v1371_v14 = vsub.f32 %v2735_v21, %v1355_v13  ;;  %v1441_v24 = vpack.c.bf16 %v2180_v57, %v2176_v51 }
 0x373   : > { %v2182_v15 = vpop.eup %2181  ;;  %v1402_v20 = vmul.f32 1.442695, %v1371_v14  ;;  %1420 = vadd.xlane.f32.xlu0 %v2178_v43 }
 0x374   : > { %v1440_v23 = vpack.c.bf16 %v2182_v15, %v2178_v43  ;;  %v2184_v27 = vpop.eup %2183 }
 0x375   : > { %2191 = vpow2.f32 %v1402_v20 }
 0x376   : > { %1951 = vmatprep.mubr.bf16.mxu1 %v1440_v23 }
 0x377   : > { %v2186_v46 = vpop.eup %2185  ;;  %1952 = vmatmul.mubr.bf16.vlgmr.msra.gmra.mrb[64].mxu1 %v1441_v24  ;;  %1428 = vadd.xlane.f32.xlu0 %v2184_v27 }
 0x378   : > { %1418 = vadd.xlane.f32.xlu1 %v2186_v46  ;;  %v1439_v29 = vpack.c.bf16 %v2186_v46, %v2170_v31  ;;  %v2188_v30 = vpop.eup %2187 }
 0x37a   : > { %1948 = vmatmul.mubr.bf16.gmra.mrb[36].mxu0 %v1439_v29 }
 0x37b   : > { %v2190_v32 = vpop.eup %2189  ;;  %1432 = vadd.xlane.f32.xlu0 %v2188_v30 }
 0x37c   : > { %1414 = vadd.xlane.f32.xlu1 %v2172_v60  ;;  %v1442_v21 = vpack.c.bf16 %v2190_v32, %v2184_v27 }
 0x37e   : > { %1955 = vmatprep.mubr.bf16.mxu1 %v1442_v21 }
 0x37f   : > { %v2192_v33 = vpop.eup %2191 }
 0x380   : > { %1426 = vadd.xlane.f32.xlu1 %v2180_v57  ;;  %v1443_v35 = vpack.c.bf16 %v2192_v33, %v2188_v30 }
 0x382   : > { %1956 = vmatmul.mubr.bf16.gmra.mrb[68].mxu1 %v1443_v35 }
 0x384   : > { %1422 = vadd.xlane.f32.xlu1 %v2182_v15 }
 0x388   : > { %1430 = vadd.xlane.f32.xlu1 %v2190_v32 }
 0x38c   : > { %1434 = vadd.xlane.f32.xlu1 %v2192_v33 }
 0x3e8   : > { %v1409_v11 = vpop.xlane.xlu0 %1408 }
 0x3e9   : > { %2193 = vrcp.f32 %v1409_v11 }
 0x3ea   : > { %v1411_v38 = vpop.xlane.xlu1 %1410 }
 0x3ec   : > { %v1405_v63 = vpop.xlane.xlu0 %1404 }
 0x3ed   : > { %2195 = vrcp.f32 %v1405_v63 }
 0x3ee   : > { %2197 = vrcp.f32 %v1411_v38 }
 0x3f0   : > { %v1407_v19 = vpop.xlane.xlu1 %1406 }
 0x3f1   : > { %2199 = vrcp.f32 %v1407_v19 }
 0x3f3   : > { %v2194_v10 = vpop.eup %2193 }
 0x3f4   : > { %v1417_v42 = vpop.xlane.xlu0 %1416 }
 0x3f5   : > { %2201 = vrcp.f32 %v1417_v42 }
 0x3f7   : > { %v2196_v18 = vpop.eup %2195 }
 0x3f8   : > { %v1413_v62 = vpop.xlane.xlu0 %1412  ;;  %v2198_v39 = vpop.eup %2197 }
 0x3fb   : > { %v2200_v28 = vpop.eup %2199 }
 0x3fc   : > { %v1425_v5 = vpop.xlane.xlu0 %1424 }
 0x3fd   : > { %2203 = vrcp.f32 %v1425_v5 }
 0x3ff   : > { %v2202_v53 = vpop.eup %2201 }
 0x400   : > { %v1421_v44 = vpop.xlane.xlu0 %1420 }
 0x401   : > { %2205 = vrcp.f32 %v1421_v44 }
 0x404   : > { %v1429_v49 = vpop.xlane.xlu0 %1428 }
 0x405   : > { %v1419_v17 = vpop.xlane.xlu1 %1418 }
 0x407   : > { %v2204_v54 = vpop.eup %2203 }
 0x408   : > { %v1433_v52 = vpop.xlane.xlu0 %1432 }
 0x409   : > { %v1415_v4 = vpop.xlane.xlu1 %1414 }
 0x40b   : > { %v2206_v56 = vpop.eup %2205 }
 0x40d   : > { %v1427_v6 = vpop.xlane.xlu1 %1426 }
 0x40e   : > { %2207 = vrcp.f32 %v1427_v6 }
 0x411   : > { %v1423_v48 = vpop.xlane.xlu1 %1422 }
 0x412   : > { %2209 = vrcp.f32 %v1423_v48 }
 0x413   : > { %2211 = vrcp.f32 %v1413_v62 }
 0x414   : > { %2213 = vrcp.f32 %v1419_v17 }
 0x415   : > { %v1431_v50 = vpop.xlane.xlu1 %1430  ;;  %2215 = vrcp.f32 %v1415_v4 }
 0x416   : > { %2217 = vrcp.f32 %v1433_v52 }
 0x417   : > { %2219 = vrcp.f32 %v1429_v49 }
 0x418   : > { %v2208_v58 = vpop.eup %2207 }
 0x419   : > { %v1435_v37 = vpop.xlane.xlu1 %1434 }
 0x41a   : > { %2221 = vrcp.f32 %v1435_v37 }
 0x41b   : > { %2223 = vrcp.f32 %v1431_v50 }
 0x41c   : > { %v2210_v60 = vpop.eup %2209 }
 0x41d   : > { %v2212_v2 = vpop.eup %2211 }
 0x41e   : > { %v2214_v9 = vpop.eup %2213 }
 0x41f   : > { %v2216_v13 = vpop.eup %2215 }
 0x420   : > { %v2218_v15 = vpop.eup %2217 }
 0x421   : > { %v2220_v23 = vpop.eup %2219 }
 0x424   : > { %v2222_v46 = vpop.eup %2221 }
 0x425   : > { %v2224_v32 = vpop.eup %2223 }
 0x439   : > { %v1945_v16 = vpop.f32.mrb[32].mxu0 }
 0x43a   : > { %v1559_v26 = vmul.f32 %v2194_v10, %v1945_v16  ;;  %v1478_v36 = vpop.f32.mrb[33].mxu0 }
 0x43b   : > { %v1557_v41 = vmul.f32 %v2196_v18, %v1478_v36  ;;  %v1946_v25 = vpop.f32.mrb[34].mxu0 }
 0x43c   : > { %1576 = vst.msk [vmem:[%s2759_s17 + $0x10] sm:$0xff] %vm1573_vm0, %v1559_v26  ;;  %v1560_v45 = vmul.f32 %v2198_v39, %v1946_v25  ;;  %v1481_v22 = vpop.f32.mrb[35].mxu0 }
 0x43d   : > { %1574 = vst.msk [vmem:[%s2759_s17] sm:$0xff] %vm1573_vm0, %v1557_v41  ;;  %v1558_v47 = vmul.f32 %v2200_v28, %v1481_v22 }
 0x43e   : > { %1577 = vst.msk [vmem:[%s2759_s17 + $0x18] sm:$0xff] %vm1573_vm0, %v1560_v45 }
 0x43f   : > { %1575 = vst.msk [vmem:[%s2759_s17 + $0x8] sm:$0xff] %vm1573_vm0, %v1558_v47 }
 0x44a   : > { %v1953_v55 = vpop.f32.mrb[64].mxu1 }
 0x44b   : > { %v1567_v31 = vmul.f32 %v2204_v54, %v1953_v55  ;;  %v1510_v40 = vpop.f32.mrb[65].mxu1 }
 0x44c   : > { %v1565_v34 = vmul.f32 %v2206_v56, %v1510_v40  ;;  %v1954_v59 = vpop.f32.mrb[66].mxu1 }
 0x44d   : > { %1584 = vst.msk [vmem:[%s2759_s17 + $0x50] sm:$0xff] %vm1573_vm0, %v1567_v31  ;;  %v1568_v61 = vmul.f32 %v2208_v58, %v1954_v59  ;;  %v1949_v0 = vpop.f32.mrb[36].mxu0  ;;  %v1513_v1 = vpop.f32.mrb[67].mxu1 }
 0x44e   : > { %1582 = vst.msk [vmem:[%s2759_s17 + $0x40] sm:$0xff] %vm1573_vm0, %v1565_v34  ;;  %v1563_v3 = vmul.f32 %v2202_v53, %v1949_v0  ;;  %v1566_v7 = vmul.f32 %v2210_v60, %v1513_v1  ;;  %v1494_v8 = vpop.f32.mrb[37].mxu0 }
 0x44f   : > { %1585 = vst.msk [vmem:[%s2759_s17 + $0x58] sm:$0xff] %vm1573_vm0, %v1568_v61  ;;  %v1561_v51 = vmul.f32 %v2212_v2, %v1494_v8  ;;  %v1950_v12 = vpop.f32.mrb[38].mxu0 }
 0x450   : > { %1580 = vst.msk [vmem:[%s2759_s17 + $0x30] sm:$0xff] %vm1573_vm0, %v1563_v3  ;;  %1583 = vst.msk [vmem:[%s2759_s17 + $0x48] sm:$0xff] %vm1573_vm0, %v1566_v7  ;;  %v1564_v43 = vmul.f32 %v2214_v9, %v1950_v12  ;;  %v1497_v14 = vpop.f32.mrb[39].mxu0 }
 0x451   : > { %1578 = vst.msk [vmem:[%s2759_s17 + $0x20] sm:$0xff] %vm1573_vm0, %v1561_v51  ;;  %v1562_v57 = vmul.f32 %v2216_v13, %v1497_v14 }
 0x452   : > { %1581 = vst.msk [vmem:[%s2759_s17 + $0x38] sm:$0xff] %vm1573_vm0, %v1564_v43 }
 0x453   : > { %1579 = vst.msk [vmem:[%s2759_s17 + $0x28] sm:$0xff] %vm1573_vm0, %v1562_v57 }
 0x455   : > { %v1957_v20 = vpop.f32.mrb[68].mxu1 }
 0x456   : > { %v1571_v24 = vmul.f32 %v2218_v15, %v1957_v20  ;;  %v1526_v27 = vpop.f32.mrb[69].mxu1 }
 0x457   : > { %v1569_v29 = vmul.f32 %v2220_v23, %v1526_v27  ;;  %v1958_v30 = vpop.f32.mrb[70].mxu1 }
 0x458   : > { %1588 = vst.msk [vmem:[%s2759_s17 + $0x70] sm:$0xff] %vm1573_vm0, %v1571_v24  ;;  %v1572_v21 = vmul.f32 %v2222_v46, %v1958_v30  ;;  %v1529_v33 = vpop.f32.mrb[71].mxu1 }
 0x459   : > { %1586 = vst.msk [vmem:[%s2759_s17 + $0x60] sm:$0xff] %vm1573_vm0, %v1569_v29  ;;  %v1570_v35 = vmul.f32 %v2224_v32, %v1529_v33 }
 0x45a   : > { %1589 = vst.msk [vmem:[%s2759_s17 + $0x78] sm:$0xff] %vm1573_vm0, %v1572_v21 }
 0x45b   : > { %1587 = vst.msk [vmem:[%s2759_s17 + $0x68] sm:$0xff] %vm1573_vm0, %v1570_v35 }
 0x45c PF: > { %p13_p8 = scmp.ge.s32.totalorder %s2389_s19, 4   ;;  %s2820_s9 = smov %s2313_s10 }
 0x45d   : > { %s2821_s10 = smov %s2317_s11  ;;  %s2822_s11 = smov %s2415_s6 }
 0x45e   : > { %s2823_s12 = smov %s2389_s19  ;;  %15 = sbr.rel (!%p13_p8) target bundleno = 4 (0x4), region = 72 }
 0x465   :  { %1611 = vsyncpa [#allocation3], 1 }
 0x466   :  { %1613 = vsyncpa [#allocation3 + $0x1], 1 }
 0x467   :  { %1614 = vsyncpa [#allocation5], 1 }

</bundles_post_ra>
